<compile_context>
chip_gen: v5e
topology: v5e:2x2
jax: 0.10.0
libtpu: 0.0.40
codegen_flags: <defaults>
</compile_context>

<pallas_src>
import functools

import jax
import jax.numpy as jnp
from jax.experimental import pallas as pl
from jax.experimental.pallas import tpu as pltpu


def _round_up(x, m):
    return ((x + m - 1) // m) * m


def _device_kind():
    try:
        return jax.devices()[0].device_kind or ""
    except Exception:  # pragma: no cover - defensive
        return ""


# --------------------------------------------------------------------------- #
# Kernel
# --------------------------------------------------------------------------- #
def _mlp_kernel(x_ref, wug_ref, bug_ref, wd_ref, bd_ref, o_ref, acc_ref,
                *, tile_i, matmul_bf16):
    i_idx = pl.program_id(1)

    @pl.when(i_idx == 0)
    def _init():
        # Fold the down-proj bias into the accumulator init (added exactly once
        # per output tile); direct broadcast write, no zeros+add pass.
        acc_ref[...] = jnp.broadcast_to(
            bd_ref[...].astype(jnp.float32), acc_ref.shape)

    mm_dtype = jnp.bfloat16 if matmul_bf16 else x_ref.dtype

    x = x_ref[...].astype(mm_dtype)          # (tile_b, H)
    w_ug = wug_ref[...].astype(mm_dtype)     # (H, 2*tile_i)  [up tile | gate tile]

    # Fused up+gate projection for this inner-dim slice; f32 MXU accumulation.
    ug = jnp.dot(x, w_ug, preferred_element_type=jnp.float32)
    ug = ug + bug_ref[...].astype(jnp.float32)

    up = ug[:, :tile_i]
    gate = ug[:, tile_i:]

    # SiLU + gating in f32 (VPU/EUP work is free filler next to the MXU).
    h = (up * jax.nn.sigmoid(up)) * gate

    # Partial down-projection for this inner-dim slice, accumulated in f32.
    acc_ref[...] += jnp.dot(h.astype(mm_dtype), wd_ref[...].astype(mm_dtype),
                            preferred_element_type=jnp.float32)

    @pl.when(i_idx == pl.num_programs(1) - 1)
    def _finalize():
        o_ref[...] = acc_ref[...].astype(o_ref.dtype)


# --------------------------------------------------------------------------- #
# Tile / VMEM selection
# --------------------------------------------------------------------------- #
def _pick_tiles(B, H, I_pad, dtype, device_kind):
    itemsize = jnp.dtype(dtype).itemsize
    sub = max(8, 32 // max(itemsize, 1))           # 8 f32, 16 bf16, 32 int8/fp8
    kind = device_kind.lower()
    is_v7 = ("v7" in kind) or ("7x" in kind)
    # v7x: 64 MiB physical per TC -> leave headroom; v5e/v6e: 128 MiB physical.
    vmem_budget = (48 if is_v7 else 100) * 1024 * 1024

    # ---- batch tile: minimize padding; bigger tiles on v6e for large B ------
    max_tb = 512 if (not is_v7 and B >= 1024) else 256
    n_b = max(1, -(-B // max_tb))
    if is_v7 and n_b == 1 and B > sub:
        n_b = 2                                   # >=2 parallel blocks: 2 TCs busy
    tile_b = min(_round_up(-(-B // n_b), sub), _round_up(B, sub))

    # ---- inner (reduction) tile ---------------------------------------------
    tile_i = 128
    for cand in (512, 256):
        if I_pad % cand == 0:
            tile_i = cand
            break

    def block_bytes(tb, ti):
        # double-buffered input/output blocks + resident f32 accumulator
        w_bytes = (H * 2 * ti + ti * H + 2 * ti + H) * itemsize
        io_bytes = 2 * tb * H * itemsize
        return 2 * (w_bytes + io_bytes) + tb * H * 4

    while block_bytes(tile_b, tile_i) > vmem_budget and tile_i > 128:
        tile_i //= 2
    while block_bytes(tile_b, tile_i) > vmem_budget and tile_b > sub:
        tile_b = max(sub, _round_up(tile_b // 2, sub))

    return tile_b, tile_i, vmem_budget


# --------------------------------------------------------------------------- #
# Forward (jitted): weight prep + pallas_call
# --------------------------------------------------------------------------- #
@functools.partial(
    jax.jit,
    static_argnames=("tile_b", "tile_i", "matmul_bf16", "vmem_limit", "I_pad"))
def _mlp_forward(x, w_up, b_up, w_gate, b_gate, w_down, b_down,
                 *, tile_b, tile_i, matmul_bf16, vmem_limit, I_pad):
    B, H = x.shape
    I = w_up.shape[0]

    # --- one-time (per compile) weight prep into MXU-native (K, N) layout ----
    wu_t = w_up.T                                  # (H, I)
    wg_t = w_gate.T                                # (H, I)
    wd_t = w_down.T                                # (I, H)
    if I_pad != I:
        wu_t = jnp.pad(wu_t, ((0, 0), (0, I_pad - I)))
        wg_t = jnp.pad(wg_t, ((0, 0), (0, I_pad - I)))
        wd_t = jnp.pad(wd_t, ((0, I_pad - I), (0, 0)))
        b_up = jnp.pad(b_up, (0, I_pad - I))
        b_gate = jnp.pad(b_gate, (0, I_pad - I))

    n_i = I_pad // tile_i
    # Fuse up & gate, interleaved at tile granularity so each inner block of
    # width 2*tile_i is [up tile i | gate tile i].
    w_ug = jnp.stack(
        [wu_t.reshape(H, n_i, tile_i), wg_t.reshape(H, n_i, tile_i)],
        axis=2).reshape(H, 2 * I_pad)
    b_ug = jnp.stack(
        [b_up.reshape(n_i, tile_i), b_gate.reshape(n_i, tile_i)],
        axis=1).reshape(1, 2 * I_pad)
    b_d = b_down.reshape(1, H)

    # --- ragged batch: pad to a multiple of tile_b ----------------------------
    B_pad = _round_up(B, tile_b)
    x_p = jnp.pad(x, ((0, B_pad - B), (0, 0))) if B_pad != B else x

    grid = (B_pad // tile_b, n_i)                  # reduction axis last

    kernel = functools.partial(_mlp_kernel, tile_i=tile_i,
                               matmul_bf16=matmul_bf16)

    out = pl.pallas_call(
        kernel,
        out_shape=jax.ShapeDtypeStruct((B_pad, H), x.dtype),
        grid_spec=pltpu.PrefetchScalarGridSpec(
            num_scalar_prefetch=0,
            grid=grid,
            in_specs=[
                pl.BlockSpec((tile_b, H), lambda b, i: (b, 0)),       # x
                pl.BlockSpec((H, 2 * tile_i), lambda b, i: (0, i)),   # [Wup|Wgate]
                pl.BlockSpec((1, 2 * tile_i), lambda b, i: (0, i)),   # [bup|bgate]
                pl.BlockSpec((tile_i, H), lambda b, i: (i, 0)),       # Wdown^T
                pl.BlockSpec((1, H), lambda b, i: (0, 0)),            # bdown
            ],
            out_specs=pl.BlockSpec((tile_b, H), lambda b, i: (b, 0)),
            scratch_shapes=[pltpu.VMEM((tile_b, H), jnp.float32)],
        ),
        compiler_params=pltpu.CompilerParams(
            dimension_semantics=("parallel", "arbitrary"),
            vmem_limit_bytes=int(vmem_limit),
        ),
    )(x_p, w_ug, b_ug, wd_t, b_d)

    return out[:B] if B_pad != B else out


# --------------------------------------------------------------------------- #
# Public wrapper
# --------------------------------------------------------------------------- #
def mlp_pallas(x, w_up, b_up, w_gate, b_gate, w_down, b_down,
               *, tile_b=None, tile_i=None, allow_bf16_matmul=False):
    """Gated-SiLU MLP forward.

    Shapes (PyTorch nn.Linear layout; transposition handled internally once):
      x:      (B, H)
      w_up:   (I, H)   b_up:   (I,)
      w_gate: (I, H)   b_gate: (I,)
      w_down: (H, I)   b_down: (H,)
    """
    B, H = x.shape
    I = w_up.shape[0]
    I_pad = _round_up(I, 128)

    tb_auto, ti_auto, vmem_limit = _pick_tiles(B, H, I_pad, x.dtype,
                                               _device_kind())
    tile_b = tb_auto if tile_b is None else int(tile_b)
    tile_i = ti_auto if tile_i is None else int(tile_i)
    assert I_pad % tile_i == 0, "tile_i must divide the padded inner_dim"

    matmul_bf16 = bool(allow_bf16_matmul) and x.dtype == jnp.float32

    return _mlp_forward(x, w_up, b_up, w_gate, b_gate, w_down, b_down,
                        tile_b=tile_b, tile_i=tile_i, matmul_bf16=matmul_bf16,
                        vmem_limit=vmem_limit, I_pad=I_pad)


def mlp_reference(x, w_up, b_up, w_gate, b_gate, w_down, b_down):
    up = x @ w_up.T + b_up
    up = up * jax.nn.sigmoid(up)
    gate = x @ w_gate.T + b_gate
    return (up * gate) @ w_down.T + b_down


# --------------------------------------------------------------------------- #
# Self-test
# --------------------------------------------------------------------------- #
if __name__ == "__main__":
    def init_linear(kw, kb, out_f, in_f):
        bound = 1.0 / (in_f ** 0.5)
        w = jax.random.uniform(kw, (out_f, in_f), jnp.float32, -bound, bound)
        b = jax.random.uniform(kb, (out_f,), jnp.float32, -bound, bound)
        return w, b

    # ---- Config 1: aligned shapes, 2-step inner-dim reduction ----------------
    batch, hidden_dim, inner_dim = 16, 128, 256
    kx, k1, k2, k3, k4, k5, k6 = jax.random.split(jax.random.PRNGKey(0), 7)
    w_up, b_up = init_linear(k1, k2, inner_dim, hidden_dim)
    w_gate, b_gate = init_linear(k3, k4, inner_dim, hidden_dim)
    w_down, b_down = init_linear(k5, k6, hidden_dim, inner_dim)
    x = jax.random.normal(kx, (batch, hidden_dim), jnp.float32)

    ref = mlp_reference(x, w_up, b_up, w_gate, b_gate, w_down, b_down)

    # Pure f32 path (exercises accumulator init/finalize with tile_i=128).
    out = mlp_pallas(x, w_up, b_up, w_gate, b_gate, w_down, b_down, tile_i=128)
    out = jax.block_until_ready(out)
    assert out.shape == (batch, hidden_dim)
    assert jnp.allclose(out, ref, atol=1e-5, rtol=1e-5), "f32 mismatch"

    # f32 inputs with bf16-operand MXU fast path (f32 accumulation).
    out_mix = mlp_pallas(x, w_up, b_up, w_gate, b_gate, w_down, b_down,
                         tile_i=128, allow_bf16_matmul=True)
    out_mix = jax.block_until_ready(out_mix)
    assert jnp.allclose(out_mix, ref, atol=5e-2, rtol=5e-2), "bf16-matmul mismatch"

    # Full bf16 path.
    cast = lambda t: t.astype(jnp.bfloat16)
    out_bf16 = mlp_pallas(cast(x), cast(w_up), cast(b_up), cast(w_gate),
                          cast(b_gate), cast(w_down), cast(b_down), tile_i=128)
    out_bf16 = jax.block_until_ready(out_bf16)
    assert jnp.allclose(out_bf16.astype(jnp.float32), ref,
                        atol=1e-1, rtol=1e-1), "bf16 mismatch"

    # ---- Config 2: ragged batch + inner_dim not a multiple of 128 ------------
    batch2, hidden2, inner2 = 10, 128, 192
    kx, k1, k2, k3, k4, k5, k6 = jax.random.split(jax.random.PRNGKey(1), 7)
    w_up2, b_up2 = init_linear(k1, k2, inner2, hidden2)
    w_gate2, b_gate2 = init_linear(k3, k4, inner2, hidden2)
    w_down2, b_down2 = init_linear(k5, k6, hidden2, inner2)
    x2 = jax.random.normal(kx, (batch2, hidden2), jnp.float32)

    ref2 = mlp_reference(x2, w_up2, b_up2, w_gate2, b_gate2, w_down2, b_down2)
    out2 = mlp_pallas(x2, w_up2, b_up2, w_gate2, b_gate2, w_down2, b_down2)
    out2 = jax.block_until_ready(out2)
    assert out2.shape == (batch2, hidden2)
    assert jnp.allclose(out2, ref2, atol=1e-5, rtol=1e-5), "padded-shape mismatch"

    print("KERNEL_OK")
</pallas_src>

<mosaic_0001>
module attributes {stable_mosaic.version = 11 : i64} {
  func.func @_mlp_kernel(%arg0: i32, %arg1: i32, %arg2: memref<16x128xf32, #tpu.memory_space<vmem>>, %arg3: memref<128x256xf32, #tpu.memory_space<vmem>>, %arg4: memref<1x256xf32, #tpu.memory_space<vmem>>, %arg5: memref<128x128xf32, #tpu.memory_space<vmem>>, %arg6: memref<1x128xf32, #tpu.memory_space<vmem>>, %arg7: memref<16x128xf32, #tpu.memory_space<vmem>>, %arg8: memref<16x128xf32, #tpu.memory_space<vmem>>) attributes {dimension_semantics = [#tpu.dimension_semantics<parallel>, #tpu.dimension_semantics<arbitrary>], iteration_bounds = array<i64: 1, 2>, scalar_prefetch = 0 : i64, scratch_operands = 1 : i64, tpu.core_type = #tpu.core_type<tc>, window_params = [{transform_indices = @transform_0, window_bounds = array<i64: 16, 128>}, {transform_indices = @transform_1, window_bounds = array<i64: 128, 256>}, {transform_indices = @transform_2, window_bounds = array<i64: 1, 256>}, {transform_indices = @transform_3, window_bounds = array<i64: 128, 128>}, {pipeline_mode = #tpu.pipeline_mode<synchronous>, transform_indices = @transform_4, window_bounds = array<i64: 1, 128>}, {transform_indices = @transform_5, window_bounds = array<i64: 16, 128>}]} {
    %c0_i32 = arith.constant 0 : i32
    %0 = arith.cmpi eq, %arg1, %c0_i32 : i32
    %1 = arith.extui %0 : i1 to i32
    %c0_i32_0 = arith.constant 0 : i32
    %2 = arith.cmpi ne, %1, %c0_i32_0 : i32
    scf.if %2 {
      %c0_15 = arith.constant 0 : index
      %c0_16 = arith.constant 0 : index
      %26 = vector.load %arg6[%c0_15, %c0_16] : memref<1x128xf32, #tpu.memory_space<vmem>>, vector<1x128xf32>
      %27 = vector.shape_cast %26 : vector<1x128xf32> to vector<1x128xf32>
      %28 = vector.broadcast %27 : vector<1x128xf32> to vector<16x128xf32>
      %c0_17 = arith.constant 0 : index
      %c0_18 = arith.constant 0 : index
      %29 = vector.load %arg8[%c0_17, %c0_18] : memref<16x128xf32, #tpu.memory_space<vmem>>, vector<16x128xf32>
      tpu.vector_store %arg8[%c0_17, %c0_18], %28 {strides = array<i32>} : memref<16x128xf32, #tpu.memory_space<vmem>>, vector<16x128xf32>,
    } else {
    }
    %c0 = arith.constant 0 : index
    %c0_1 = arith.constant 0 : index
    %3 = vector.load %arg2[%c0, %c0_1] : memref<16x128xf32, #tpu.memory_space<vmem>>, vector<16x128xf32>
    %c0_2 = arith.constant 0 : index
    %c0_3 = arith.constant 0 : index
    %4 = vector.load %arg3[%c0_2, %c0_3] : memref<128x256xf32, #tpu.memory_space<vmem>>, vector<128x256xf32>
    %cst = arith.constant dense<0.000000e+00> : vector<16x256xf32>
    %5 = tpu.matmul %3, %4, %cst {dimension_numbers = #tpu.dot_dimension_numbers<[1], [0], [0], [1], [0, 0, 1, 1], [], []>} : vector<16x128xf32>, vector<128x256xf32>, vector<16x256xf32> -> vector<16x256xf32>
    %c0_4 = arith.constant 0 : index
    %c0_5 = arith.constant 0 : index
    %6 = vector.load %arg4[%c0_4, %c0_5] : memref<1x256xf32, #tpu.memory_space<vmem>>, vector<1x256xf32>
    %7 = vector.broadcast %6 : vector<1x256xf32> to vector<16x256xf32>
    %8 = arith.addf %5, %7 : vector<16x256xf32>
    %9 = vector.extract_strided_slice %8 {offsets = [0, 0], sizes = [16, 128], strides = [1, 1]} : vector<16x256xf32> to vector<16x128xf32>
    %10 = vector.extract_strided_slice %8 {offsets = [0, 128], sizes = [16, 128], strides = [1, 1]} : vector<16x256xf32> to vector<16x128xf32>
    %11 = arith.negf %9 : vector<16x128xf32>
    %12 = math.exp %11 : vector<16x128xf32>
    %cst_6 = arith.constant 1.000000e+00 : f32
    %13 = vector.broadcast %cst_6 : f32 to vector<16x128xf32>
    %14 = arith.addf %13, %12 : vector<16x128xf32>
    %15 = arith.divf %13, %14 : vector<16x128xf32>
    %16 = arith.mulf %9, %15 : vector<16x128xf32>
    %17 = arith.mulf %16, %10 : vector<16x128xf32>
    %c0_7 = arith.constant 0 : index
    %c0_8 = arith.constant 0 : index
    %18 = vector.load %arg8[%c0_7, %c0_8] : memref<16x128xf32, #tpu.memory_space<vmem>>, vector<16x128xf32>
    %c0_9 = arith.constant 0 : index
    %c0_10 = arith.constant 0 : index
    %19 = vector.load %arg5[%c0_9, %c0_10] : memref<128x128xf32, #tpu.memory_space<vmem>>, vector<128x128xf32>
    %cst_11 = arith.constant dense<0.000000e+00> : vector<16x128xf32>
    %20 = tpu.matmul %17, %19, %cst_11 {dimension_numbers = #tpu.dot_dimension_numbers<[1], [0], [0], [1], [0, 0, 1, 1], [], []>} : vector<16x128xf32>, vector<128x128xf32>, vector<16x128xf32> -> vector<16x128xf32>
    %21 = arith.addf %18, %20 : vector<16x128xf32>
    %c0_12 = arith.constant 0 : index
    %c0_13 = arith.constant 0 : index
    %22 = vector.load %arg8[%c0_12, %c0_13] : memref<16x128xf32, #tpu.memory_space<vmem>>, vector<16x128xf32>
    tpu.vector_store %arg8[%c0_12, %c0_13], %21 {strides = array<i32>} : memref<16x128xf32, #tpu.memory_space<vmem>>, vector<16x128xf32>,
    %c1_i32 = arith.constant 1 : i32
    %23 = arith.cmpi eq, %arg1, %c1_i32 : i32
    %24 = arith.extui %23 : i1 to i32
    %c0_i32_14 = arith.constant 0 : i32
    %25 = arith.cmpi ne, %24, %c0_i32_14 : i32
    scf.if %25 {
      %c0_15 = arith.constant 0 : index
      %c0_16 = arith.constant 0 : index
      %26 = vector.load %arg8[%c0_15, %c0_16] : memref<16x128xf32, #tpu.memory_space<vmem>>, vector<16x128xf32>
      %c0_17 = arith.constant 0 : index
      %c0_18 = arith.constant 0 : index
      %27 = vector.load %arg7[%c0_17, %c0_18] : memref<16x128xf32, #tpu.memory_space<vmem>>, vector<16x128xf32>
      tpu.vector_store %arg7[%c0_17, %c0_18], %26 {strides = array<i32>} : memref<16x128xf32, #tpu.memory_space<vmem>>, vector<16x128xf32>,
    } else {
    }
    return
  }
  func.func @transform_0(%arg0: i32, %arg1: i32) -> (i32, i32) {
    %c0_i32 = arith.constant 0 : i32
    %c0_i32_0 = arith.constant 0 : i32
    return %arg0, %c0_i32 : i32, i32
  }
  func.func @transform_1(%arg0: i32, %arg1: i32) -> (i32, i32) {
    %c0_i32 = arith.constant 0 : i32
    %c0_i32_0 = arith.constant 0 : i32
    return %c0_i32, %arg1 : i32, i32
  }
  func.func @transform_2(%arg0: i32, %arg1: i32) -> (i32, i32) {
    %c0_i32 = arith.constant 0 : i32
    %c0_i32_0 = arith.constant 0 : i32
    return %c0_i32, %arg1 : i32, i32
  }
  func.func @transform_3(%arg0: i32, %arg1: i32) -> (i32, i32) {
    %c0_i32 = arith.constant 0 : i32
    %c0_i32_0 = arith.constant 0 : i32
    return %arg1, %c0_i32 : i32, i32
  }
  func.func @transform_4(%arg0: i32, %arg1: i32) -> (i32, i32) {
    %c0_i32 = arith.constant 0 : i32
    %c0_i32_0 = arith.constant 0 : i32
    %c0_i32_1 = arith.constant 0 : i32
    return %c0_i32, %c0_i32_0 : i32, i32
  }
  func.func @transform_5(%arg0: i32, %arg1: i32) -> (i32, i32) {
    %c0_i32 = arith.constant 0 : i32
    %c0_i32_0 = arith.constant 0 : i32
    return %arg0, %c0_i32 : i32, i32
  }
}

</mosaic_0001>

<bundles_post_ra>
// kernel: _mlp_forward.1
= control target key start
LH: loop header
LB: loop body
LE: loop exit
PB: predicated region body
PF: predicated region fallthrough
CT: control target
= control target key end

     0   :  { %10 = vsyncpa [#allocation5], 0  ;;  %s872_s18 = smov 0   ;;  %s874_s19 = smov 0   ;;  %s1086_s0 = inlined_call_operand.vmem [shape: f32[16,128], index: 0, kind: input, shape index: {}]   ;;  %s1087_s1 = inlined_call_operand.vmem [shape: f32[128,512], index: 1, kind: input, shape index: {}]   ;;  %s1088_s2 = inlined_call_operand.vmem [shape: f32[1,512], index: 2, kind: input, shape index: {}]   ;;  %s1089_s3 = inlined_call_operand.vmem [shape: f32[256,128], index: 3, kind: input, shape index: {}]   ;;  %s1090_s4 = inlined_call_operand.vmem [shape: f32[1,128], index: 4, kind: input, shape index: {}]   ;;  %s1091_s5 = inlined_call_operand.hbm [shape: f32[16,128], index: 5, kind: output, shape index: {}]  }
   0x1   :  { %s876_s20 = smov 0   ;;  %s878_s21 = smov 0  }
   0x2   :  { %s880_s22 = smov 0  }
   0x3 LB: > { %s672_s23 = sadd.s32 4294967295, %s837_s22   ;;  %s25_s24 = sadd.s32 1, %s833_s21  ;;  %s837_s22 = sphi %s880_s22, %s16_s22   ;;  %s833_s21 = sphi %s878_s21, %s1095_s21   ;;  %s829_s20 = sphi %s876_s20, %s1094_s20   ;;  %s825_s19 = sphi %s874_s19, %s1093_s19   ;;  %s821_s18 = sphi %s872_s18, %s1092_s18  }
   0x4   : > { %p26_p0 = scmp.ge.s32.totalorder %s25_s24, 2  ;;  %p68_p1 = scmp.ne.s32.totalorder %s825_s19, %s821_s18 }
   0x5   : > { %p69_p2 = scmp.eq.s32.totalorder %s837_s22, 0  ;;  %s61_s26 = sadd.s32 1, %s825_s19 }
   0x6   : > { %s1097_s24 = smov (%p26_p0, %s25_s24), 0  ;;  %p675_p5 = scmp.ge.s32.totalorder %s837_s22, 2 }
   0x7   : > { %p70_p3 = por %p69_p2, %p68_p1  ;;  %s58_s25 = ssub.s32 %s833_s21, %s1097_s24 }
   0x8   : > { %p59_p4 = scmp.eq.s32.totalorder %s58_s25, 0  ;;  %205 = sbr.rel (%p675_p5) target bundleno = 49 (0x31), region = 24 }
   0xa   : > { %s908_s27 = scalar_select %p59_p4, %s825_s19, %s61_s26  }
   0xd   : > { %208 = sbr.rel (!%p70_p3) target bundleno = 49 (0x31), region = 28  ;;  %s210_s28 = sand.u32 (%p70_p3), 1, %s825_s19  }
   0xe   : > { %s692_s29 = sshll.u32 (%p70_p3), %s833_s21, 4  ;;  %s676_s30 = sshll.u32 (%p70_p3), %s210_s28, 8 }
   0xf   : > { %s916_s8 = scalar_lea.vmem (%p70_p3), %s1087_s1, %s692_s29  ;;  %s921_s9 = scalar_lea.vmem (%p70_p3), [#allocation3], %s676_s30 }
  0x10   : > { %v228_v0 = vld [vmem:[%s916_s8] sm:$0xff] (%p70_p3)  ;;  %v230_v1 = vld [vmem:[%s916_s8 + $0x8] sm:$0xff] (%p70_p3) }
  0x11   : > { %v232_v2 = vld [vmem:[%s916_s8 + $0x20] sm:$0xff] (%p70_p3)  ;;  %229 = vst [vmem:[%s921_s9] sm:$0xff] (%p70_p3), %v228_v0  ;;  %v234_v3 = vld [vmem:[%s916_s8 + $0x28] sm:$0xff] (%p70_p3) }
  0x12   : > { %231 = vst [vmem:[%s921_s9 + $0x8] sm:$0xff] %v230_v1  ;;  %v236_v4 = vld [vmem:[%s916_s8 + $0x40] sm:$0xff]  ;;  %v238_v5 = vld [vmem:[%s916_s8 + $0x48] sm:$0xff] }
  0x13   : > { %233 = vst [vmem:[%s921_s9 + $0x10] sm:$0xff] %v232_v2  ;;  %v240_v6 = vld [vmem:[%s916_s8 + $0x60] sm:$0xff]  ;;  %v242_v7 = vld [vmem:[%s916_s8 + $0x68] sm:$0xff] }
  0x14   : > { %235 = vst [vmem:[%s921_s9 + $0x18] sm:$0xff] %v234_v3  ;;  %v244_v8 = vld [vmem:[%s916_s8 + $0x80] sm:$0xff]  ;;  %v246_v9 = vld [vmem:[%s916_s8 + $0x88] sm:$0xff] }
  0x15   : > { %237 = vst [vmem:[%s921_s9 + $0x20] sm:$0xff] %v236_v4  ;;  %v248_v10 = vld [vmem:[%s916_s8 + $0xa0] sm:$0xff]  ;;  %v250_v11 = vld [vmem:[%s916_s8 + $0xa8] sm:$0xff] }
  0x16   : > { %239 = vst [vmem:[%s921_s9 + $0x28] sm:$0xff] %v238_v5  ;;  %v252_v12 = vld [vmem:[%s916_s8 + $0xc0] sm:$0xff]  ;;  %v254_v13 = vld [vmem:[%s916_s8 + $0xc8] sm:$0xff] }
  0x17   : > { %241 = vst [vmem:[%s921_s9 + $0x30] sm:$0xff] %v240_v6  ;;  %v256_v14 = vld [vmem:[%s916_s8 + $0xe0] sm:$0xff]  ;;  %v258_v15 = vld [vmem:[%s916_s8 + $0xe8] sm:$0xff] }
  0x18   : > { %243 = vst [vmem:[%s921_s9 + $0x38] sm:$0xff] %v242_v7  ;;  %v260_v16 = vld [vmem:[%s916_s8 + $0x100] sm:$0xff]  ;;  %v262_v17 = vld [vmem:[%s916_s8 + $0x108] sm:$0xff] }
  0x19   : > { %245 = vst [vmem:[%s921_s9 + $0x40] sm:$0xff] %v244_v8  ;;  %v264_v18 = vld [vmem:[%s916_s8 + $0x120] sm:$0xff]  ;;  %v266_v19 = vld [vmem:[%s916_s8 + $0x128] sm:$0xff] }
  0x1a   : > { %247 = vst [vmem:[%s921_s9 + $0x48] sm:$0xff] %v246_v9  ;;  %v268_v20 = vld [vmem:[%s916_s8 + $0x140] sm:$0xff]  ;;  %v270_v21 = vld [vmem:[%s916_s8 + $0x148] sm:$0xff] }
  0x1b   : > { %249 = vst [vmem:[%s921_s9 + $0x50] sm:$0xff] %v248_v10  ;;  %v272_v22 = vld [vmem:[%s916_s8 + $0x160] sm:$0xff]  ;;  %v274_v23 = vld [vmem:[%s916_s8 + $0x168] sm:$0xff] }
  0x1c   : > { %251 = vst [vmem:[%s921_s9 + $0x58] sm:$0xff] %v250_v11  ;;  %v276_v24 = vld [vmem:[%s916_s8 + $0x180] sm:$0xff]  ;;  %v278_v25 = vld [vmem:[%s916_s8 + $0x188] sm:$0xff] }
  0x1d   : > { %253 = vst [vmem:[%s921_s9 + $0x60] sm:$0xff] %v252_v12  ;;  %v280_v26 = vld [vmem:[%s916_s8 + $0x1a0] sm:$0xff]  ;;  %v282_v27 = vld [vmem:[%s916_s8 + $0x1a8] sm:$0xff] }
  0x1e   : > { %255 = vst [vmem:[%s921_s9 + $0x68] sm:$0xff] %v254_v13  ;;  %v284_v28 = vld [vmem:[%s916_s8 + $0x1c0] sm:$0xff]  ;;  %v286_v29 = vld [vmem:[%s916_s8 + $0x1c8] sm:$0xff] }
  0x1f   : > { %257 = vst [vmem:[%s921_s9 + $0x70] sm:$0xff] %v256_v14  ;;  %v288_v30 = vld [vmem:[%s916_s8 + $0x1e0] sm:$0xff]  ;;  %v290_v31 = vld [vmem:[%s916_s8 + $0x1e8] sm:$0xff] }
  0x20   : > { %259 = vst [vmem:[%s921_s9 + $0x78] sm:$0xff] %v258_v15 }
  0x21   : > { %261 = vst [vmem:[%s921_s9 + $0x80] sm:$0xff] %v260_v16 }
  0x22   : > { %263 = vst [vmem:[%s921_s9 + $0x88] sm:$0xff] %v262_v17 }
  0x23   : > { %265 = vst [vmem:[%s921_s9 + $0x90] sm:$0xff] %v264_v18 }
  0x24   : > { %267 = vst [vmem:[%s921_s9 + $0x98] sm:$0xff] %v266_v19 }
  0x25   : > { %269 = vst [vmem:[%s921_s9 + $0xa0] sm:$0xff] %v268_v20 }
  0x26   : > { %271 = vst [vmem:[%s921_s9 + $0xa8] sm:$0xff] %v270_v21 }
  0x27   : > { %273 = vst [vmem:[%s921_s9 + $0xb0] sm:$0xff] %v272_v22 }
  0x28   : > { %275 = vst [vmem:[%s921_s9 + $0xb8] sm:$0xff] %v274_v23 }
  0x29   : > { %277 = vst [vmem:[%s921_s9 + $0xc0] sm:$0xff] %v276_v24 }
  0x2a   : > { %279 = vst [vmem:[%s921_s9 + $0xc8] sm:$0xff] %v278_v25 }
  0x2b   : > { %281 = vst [vmem:[%s921_s9 + $0xd0] sm:$0xff] %v280_v26 }
  0x2c   : > { %283 = vst [vmem:[%s921_s9 + $0xd8] sm:$0xff] %v282_v27 }
  0x2d   : > { %285 = vst [vmem:[%s921_s9 + $0xe0] sm:$0xff] %v284_v28 }
  0x2e   : > { %287 = vst [vmem:[%s921_s9 + $0xe8] sm:$0xff] %v286_v29 }
  0x2f   : > { %289 = vst [vmem:[%s921_s9 + $0xf0] sm:$0xff] %v288_v30 }
  0x30   : > { %291 = vst [vmem:[%s921_s9 + $0xf8] sm:$0xff] %v290_v31 }
  0x31 PF: > { %p679_p6 = scmp.ge.s32.totalorder %s837_s22, 1  ;;  %p313_p7 = scmp.lt.s32.totalorder %s837_s22, 3 }
  0x33   : > { %p314_p8 = pnand %p679_p6, %p313_p7 }
  0x34   : > { %s320_s10 = sand.u32 (!%p314_p8), 1, %s821_s18   ;;  %s681_s11 = sshll.u32 (!%p314_p8), %s829_s20, 1 }
  0x35   : > { %317 = sbr.rel (%p314_p8) target bundleno = 417 (0x1a1), region = 59  ;;  %s680_s12 = sshll.u32 (!%p314_p8), %s320_s10, 8 }
  0x36   : > { %p364_p9 = scmp.lt.s32.totalorder (!%p314_p8), %s681_s11, 3  ;;  %s682_s13 = sshll.u32 (!%p314_p8), %s829_s20, 4 }
  0x37   : > { %p369_p10 = scmp.lt.s32.totalorder (!%p314_p8), %s682_s13, 31  ;;  %s1000_s18 = scalar_lea.vmem (!%p314_p8), [#allocation3], %s680_s12 }
  0x38   : > { %p684_p11 = scmp.ne.s32.totalorder (!%p314_p8), %s829_s20, 0 }
  0x3a   : > { %s1099_s11 = smov (!%p364_p9, %s681_s11), 3  ;;  %s1101_s13 = smov (!%p369_p10, %s682_s13), 31 }
  0x3b   : > { %s366_s16 = scalar_lea.vmem %s1088_s2, %s1099_s11  ;;  %s683_s17 = sshll.u32 %s1101_s13, 3 }
  0x3c   : > { %s998_s28 = scalar_lea.vmem %s1089_s3, %s683_s17  ;;  %378 = sbr.rel (%p684_p11) target bundleno = 68 (0x44), region = 67 }
  0x41   : > { %v758_v32 = vld [vmem:[%s1090_s4] ss:$0 sm:$0xff] }
  0x42   : > { %383 = vst [vmem:[#allocation2] sm:$0xff] %v758_v32 }
  0x43   : > { %384 = vst [vmem:[#allocation2 + $0x8] sm:$0xff] %v758_v32 }
  0x44 PF: > { %v417_v33 = vld [vmem:[%s1000_s18 + $0xf0] sm:$0xff]  ;;  %v415_v34 = vld [vmem:[%s1000_s18 + $0xe0] sm:$0xff]  ;;  %v418_v37 = vld [vmem:[%s1000_s18 + $0xf8] sm:$0xff]  ;;  %p687_p12 = scmp.ne.s32.totalorder %s829_s20, 1 }
  0x45   : > { %425 = vmatpush.msra.mxu0 %v417_v33  ;;  %693 = vmatpush.msra.mxu3 %v417_v33  ;;  %v413_v35 = vld [vmem:[%s1000_s18 + $0xd0] sm:$0xff]  ;;  %v411_v36 = vld [vmem:[%s1000_s18 + $0xc0] sm:$0xff]  ;;  %v416_v38 = vld [vmem:[%s1000_s18 + $0xe8] sm:$0xff] }
  0x46   : > { %v409_v39 = vld [vmem:[%s1000_s18 + $0xb0] sm:$0xff]  ;;  %448 = vmatpush.msra.mxu1 %v418_v37  ;;  %v414_v40 = vld [vmem:[%s1000_s18 + $0xd8] sm:$0xff]  ;;  %v407_v41 = vld [vmem:[%s1000_s18 + $0xa0] sm:$0xff] }
  0x47   : > { %426 = vmatpush.msra.mxu0 %v415_v34  ;;  %694 = vmatpush.msra.mxu3 %v415_v34  ;;  %v412_v42 = vld [vmem:[%s1000_s18 + $0xc8] sm:$0xff]  ;;  %v405_v43 = vld [vmem:[%s1000_s18 + $0x90] sm:$0xff]  ;;  %v410_v44 = vld [vmem:[%s1000_s18 + $0xb8] sm:$0xff] }
  0x48   : > { %449 = vmatpush.msra.mxu1 %v416_v38  ;;  %v403_v45 = vld [vmem:[%s1000_s18 + $0x80] sm:$0xff]  ;;  %v408_v46 = vld [vmem:[%s1000_s18 + $0xa8] sm:$0xff]  ;;  %v401_v47 = vld [vmem:[%s1000_s18 + $0x70] sm:$0xff] }
  0x49   : > { %427 = vmatpush.msra.mxu0 %v413_v35  ;;  %695 = vmatpush.msra.mxu3 %v413_v35  ;;  %v406_v48 = vld [vmem:[%s1000_s18 + $0x98] sm:$0xff]  ;;  %v399_v49 = vld [vmem:[%s1000_s18 + $0x60] sm:$0xff]  ;;  %v404_v50 = vld [vmem:[%s1000_s18 + $0x88] sm:$0xff] }
  0x4a   : > { %450 = vmatpush.msra.mxu1 %v414_v40  ;;  %v397_v51 = vld [vmem:[%s1000_s18 + $0x50] sm:$0xff]  ;;  %v402_v52 = vld [vmem:[%s1000_s18 + $0x78] sm:$0xff]  ;;  %v395_v53 = vld [vmem:[%s1000_s18 + $0x40] sm:$0xff] }
  0x4b   : > { %428 = vmatpush.msra.mxu0 %v411_v36  ;;  %696 = vmatpush.msra.mxu3 %v411_v36  ;;  %v400_v54 = vld [vmem:[%s1000_s18 + $0x68] sm:$0xff]  ;;  %v393_v55 = vld [vmem:[%s1000_s18 + $0x30] sm:$0xff]  ;;  %v398_v56 = vld [vmem:[%s1000_s18 + $0x58] sm:$0xff] }
  0x4c   : > { %451 = vmatpush.msra.mxu1 %v412_v42  ;;  %v391_v57 = vld [vmem:[%s1000_s18 + $0x20] sm:$0xff]  ;;  %v396_v58 = vld [vmem:[%s1000_s18 + $0x48] sm:$0xff]  ;;  %v389_v59 = vld [vmem:[%s1000_s18 + $0x10] sm:$0xff] }
  0x4d   : > { %429 = vmatpush.msra.mxu0 %v409_v39  ;;  %697 = vmatpush.msra.mxu3 %v409_v39  ;;  %v394_v60 = vld [vmem:[%s1000_s18 + $0x38] sm:$0xff]  ;;  %v387_v61 = vld [vmem:[%s1000_s18] sm:$0xff]  ;;  %v385_v62 = vld [vmem:[%s1086_s0] sm:$0xff] }
  0x4e   : > { %452 = vmatpush.msra.mxu1 %v410_v44  ;;  %v386_v63 = vld [vmem:[%s1086_s0 + $0x8] sm:$0xff]  ;;  %v392_v0 = vld [vmem:[%s1000_s18 + $0x28] sm:$0xff]  ;;  %v529_v4 = vld [vmem:[%s998_s28 + $0x70] sm:$0xff] }
  0x4f   : > { %430 = vmatpush.msra.mxu0 %v407_v41  ;;  %698 = vmatpush.msra.mxu3 %v407_v41  ;;  %v390_v1 = vld [vmem:[%s1000_s18 + $0x18] sm:$0xff]  ;;  %v388_v2 = vld [vmem:[%s1000_s18 + $0x8] sm:$0xff]  ;;  %v527_v6 = vld [vmem:[%s998_s28 + $0x60] sm:$0xff] }
  0x50   : > { %453 = vmatpush.msra.mxu1 %v408_v46  ;;  %v530_v3 = vld [vmem:[%s998_s28 + $0x78] sm:$0xff]  ;;  %v528_v5 = vld [vmem:[%s998_s28 + $0x68] sm:$0xff]  ;;  %v525_v8 = vld [vmem:[%s998_s28 + $0x50] sm:$0xff] }
  0x51   : > { %431 = vmatpush.msra.mxu0 %v405_v43  ;;  %699 = vmatpush.msra.mxu3 %v405_v43  ;;  %v526_v7 = vld [vmem:[%s998_s28 + $0x58] sm:$0xff]  ;;  %v524_v9 = vld [vmem:[%s998_s28 + $0x48] sm:$0xff]  ;;  %v523_v10 = vld [vmem:[%s998_s28 + $0x40] sm:$0xff] }
  0x52   : > { %454 = vmatpush.msra.mxu1 %v406_v48  ;;  %531 = vmatpush.msra.mxu2 %v530_v3  ;;  %v522_v11 = vld [vmem:[%s998_s28 + $0x38] sm:$0xff]  ;;  %v521_v12 = vld [vmem:[%s998_s28 + $0x30] sm:$0xff]  ;;  %v520_v13 = vld [vmem:[%s998_s28 + $0x28] sm:$0xff] }
  0x53   : > { %432 = vmatpush.msra.mxu0 %v403_v45  ;;  %700 = vmatpush.msra.mxu3 %v403_v45  ;;  %v519_v14 = vld [vmem:[%s998_s28 + $0x20] sm:$0xff]  ;;  %v518_v16 = vld [vmem:[%s998_s28 + $0x18] sm:$0xff]  ;;  %v517_v18 = vld [vmem:[%s998_s28 + $0x10] sm:$0xff] }
  0x54   : > { %455 = vmatpush.msra.mxu1 %v404_v50  ;;  %532 = vmatpush.msra.mxu2 %v529_v4  ;;  %v419_v15 = vld [vmem:[%s366_s16] sm:$0x3]  ;;  %v516_v19 = vld [vmem:[%s998_s28 + $0x8] sm:$0xff] }
  0x55   : > { %433 = vmatpush.msra.mxu0 %v401_v47  ;;  %701 = vmatpush.msra.mxu3 %v401_v47  ;;  %v421_v17 = vperm.slane %v419_v15, 0  ;;  %v515_v22 = vld [vmem:[%s998_s28] sm:$0xff]  ;;  %v422_v38 = vperm.slane %v419_v15, 1 }
  0x56   : > { %456 = vmatpush.msra.mxu1 %v402_v52  ;;  %533 = vmatpush.msra.mxu2 %v528_v5 }
  0x57   : > { %434 = vmatpush.msra.mxu0 %v399_v49  ;;  %702 = vmatpush.msra.mxu3 %v399_v49 }
  0x58   : > { %457 = vmatpush.msra.mxu1 %v400_v54  ;;  %534 = vmatpush.msra.mxu2 %v527_v6 }
  0x59   : > { %435 = vmatpush.msra.mxu0 %v397_v51  ;;  %703 = vmatpush.msra.mxu3 %v397_v51 }
  0x5a   : > { %458 = vmatpush.msra.mxu1 %v398_v56  ;;  %535 = vmatpush.msra.mxu2 %v526_v7 }
  0x5b   : > { %436 = vmatpush.msra.mxu0 %v395_v53  ;;  %704 = vmatpush.msra.mxu3 %v395_v53 }
  0x5c   : > { %459 = vmatpush.msra.mxu1 %v396_v58  ;;  %536 = vmatpush.msra.mxu2 %v525_v8 }
  0x5d   : > { %437 = vmatpush.msra.mxu0 %v393_v55  ;;  %705 = vmatpush.msra.mxu3 %v393_v55 }
  0x5e   : > { %460 = vmatpush.msra.mxu1 %v394_v60  ;;  %537 = vmatpush.msra.mxu2 %v524_v9  ;;  %v513_v60 = vld [vmem:[#allocation2] sm:$0xff] }
  0x5f   : > { %438 = vmatpush.msra.mxu0 %v391_v57  ;;  %706 = vmatpush.msra.mxu3 %v391_v57 }
  0x60   : > { %461 = vmatpush.msra.mxu1 %v392_v0  ;;  %538 = vmatpush.msra.mxu2 %v523_v10 }
  0x61   : > { %439 = vmatpush.msra.mxu0 %v389_v59  ;;  %707 = vmatpush.msra.mxu3 %v389_v59 }
  0x62   : > { %462 = vmatpush.msra.mxu1 %v390_v1  ;;  %539 = vmatpush.msra.mxu2 %v522_v11 }
  0x63   : > { %440 = vmatpush.msra.mxu0 %v387_v61  ;;  %708 = vmatpush.msra.mxu3 %v387_v61 }
  0x64   : > { %441 = vmatmul.f32.vlgmr.msra.gmra.mxu0 %v385_v62  ;;  %444 = vmatmul.f32.vlgmr.msra.gmra.mxu3 %v386_v63 }
  0x65   : > { %463 = vmatpush.msra.mxu1 %v388_v2  ;;  %540 = vmatpush.msra.mxu2 %v521_v12 }
  0x66   : > { %464 = vmatmul.f32.vlgmr.msra.gmra.mxu1 %v385_v62 }
  0x67   : > { %541 = vmatpush.msra.mxu2 %v520_v13 }
  0x69   : > { %542 = vmatpush.msra.mxu2 %v519_v14 }
  0x6b   : > { %543 = vmatpush.msra.mxu2 %v518_v16 }
  0x6d   : > { %544 = vmatpush.msra.mxu2 %v517_v18 }
  0x6e   : > { %467 = vmatmul.f32.gmra.mxu1 %v386_v63  ;;  %v514_v63 = vld [vmem:[#allocation2 + $0x8] sm:$0xff] }
  0x6f   : > { %545 = vmatpush.msra.mxu2 %v516_v19 }
  0x71   : > { %546 = vmatpush.msra.mxu2 %v515_v22 }
  0xe1   : > { %v442_v20 = vpop.f32.mrf.mxu0 }
  0xe2   : > { %v443_v21 = vadd.f32 %v442_v20, %v421_v17 }
  0xe3   : > { %v465_v35 = vpop.f32.mrf.mxu1 }
  0xe4   : > { %v685_v23 = vmul.f32 -1.442695, %v443_v21  ;;  %v466_v45 = vadd.f32 %v465_v35, %v422_v38 }
  0xe6   : > { %759 = vpow2.f32 %v685_v23 }
  0xe7   : > { %v445_v24 = vpop.f32.mrf.mxu3 }
  0xe8   : > { %v446_v25 = vadd.f32 %v445_v24, %v421_v17 }
  0xea   : > { %v686_v26 = vmul.f32 -1.442695, %v446_v25 }
  0xeb   : > { %v468_v54 = vpop.f32.mrf.mxu1 }
  0xec   : > { %v760_v27 = vpop.eup %759  ;;  %761 = vpow2.f32 %v686_v26  ;;  %v469_v58 = vadd.f32 %v468_v54, %v422_v38 }
  0xed   : > { %v477_v28 = vadd.f32 1.0, %v760_v27 }
  0xef   : > { %763 = vrcp.f32 %v477_v28  ;;  %v490_v34 = vand.u32 2147483648, %v477_v28  ;;  %v488_v37 = vand.u32 2147483647, %v477_v28  ;;  %vm484_vm1 = vweird.f32 %v477_v28 }
  0xf1   : > { %v491_v42 = vor.u32 1.1754944e-38, %v490_v34  ;;  %vm489_vm3 = vcmp.eq.f32.partialorder %v488_v37, 8.507059e+37 }
  0xf2   : > { %v762_v29 = vpop.eup %761 }
  0xf3   : > { %v478_v30 = vadd.f32 1.0, %v762_v29 }
  0xf5   : > { %v764_v31 = vpop.eup %763  ;;  %765 = vrcp.f32 %v478_v30  ;;  %v505_v47 = vand.u32 2147483648, %v478_v30  ;;  %v503_v50 = vand.u32 2147483647, %v478_v30  ;;  %vm499_vm5 = vweird.f32 %v478_v30 }
  0xf6   : > { %v480_v32 = vmul.f32 %v764_v31, %v477_v28  ;;  %vm485_vm0 = vweird.f32 %v764_v31 }
  0xf7   : > { %vm486_vm2 = vmor %vm484_vm1, %vm485_vm0  ;;  %v506_v53 = vor.u32 1.1754944e-38, %v505_v47  ;;  %vm504_vm7 = vcmp.eq.f32.partialorder %v503_v50, 8.507059e+37 }
  0xf8   : > { %v481_v33 = vsub.f32 1.0, %v480_v32 }
  0xfa   : > { %v482_v36 = vmul.f32 %v764_v31, %v481_v33 }
  0xfb   : > { %v766_v39 = vpop.eup %765 }
  0xfc   : > { %v483_v40 = vadd.f32 %v764_v31, %v482_v36  ;;  %v495_v41 = vmul.f32 %v766_v39, %v478_v30  ;;  %vm500_vm4 = vweird.f32 %v766_v39 }
  0xfd   : > { %vm501_vm6 = vmor %vm499_vm5, %vm500_vm4 }
  0xfe   : > { %v487_v43 = vsel %vm486_vm2, %v764_v31, %v483_v40  ;;  %v496_v44 = vsub.f32 1.0, %v495_v41 }
  0xff   : > { %v492_v46 = vsel %vm489_vm3, %v491_v42, %v487_v43 }
 0x100   : > { %v509_v48 = vmul.f32 %v492_v46, %v443_v21  ;;  %v497_v49 = vmul.f32 %v766_v39, %v496_v44 }
 0x102   : > { %v498_v51 = vadd.f32 %v766_v39, %v497_v49  ;;  %v511_v52 = vmul.f32 %v509_v48, %v466_v45 }
 0x104   : > { %v502_v55 = vsel %vm501_vm6, %v766_v39, %v498_v51  ;;  %547 = vmatmul.f32.vlgmr.msra.gmra.mxu2 %v511_v52 }
 0x105   : > { %v507_v56 = vsel %vm504_vm7, %v506_v53, %v502_v55 }
 0x106   : > { %v510_v57 = vmul.f32 %v507_v56, %v446_v25 }
 0x108   : > { %v512_v59 = vmul.f32 %v510_v57, %v469_v58 }
 0x10c   : > { %550 = vmatmul.f32.gmra.mxu2 %v512_v59 }
 0x187   : > { %v548_v61 = vpop.f32.mrf.mxu2 }
 0x188   : > { %v554_v62 = vadd.f32 %v548_v61, %v513_v60 }
 0x18a   : > { %556 = vst [vmem:[#allocation2] sm:$0xff] %v554_v62 }
 0x18e   : > { %561 = sbr.rel (%p687_p12) target bundleno = 411 (0x19b), region = 71 }
 0x18f   : > { %v551_v0 = vpop.f32.mrf.mxu2 }
 0x190   : > { %v555_v1 = vadd.f32 %v551_v0, %v514_v63 }
 0x192   : > { %557 = vst [vmem:[#allocation2 + $0x8] sm:$0xff] %v555_v1 }
 0x193   : > { %v562_v2 = vld [vmem:[#allocation2] sm:$0xff] }
 0x194   : > { %564 = vst [vmem:[#allocation4] sm:$0xff] %v562_v2 }
 0x199   : > { %v563_v3 = vld [vmem:[#allocation2 + $0x8] sm:$0xff] }
 0x19a   : > { %565 = vst [vmem:[#allocation4 + $0x8] sm:$0xff] %v563_v3 }
 0x19b PF: > { %p713_p13 = scmp.eq.s32.totalorder %s672_s23, 1  ;;  %s576_s14 = sshll.u32 %s1091_s5, 4  ;;  %s577_s14 = int_to_ptr.hbm [resolvable:$true] %s576_s14 }
 0x19c   : > { %s839_s15 = smov [#allocation4]   ;;  %s840_s17 = smov 128  }
 0x19d   : > { %s574_s16 = sshll.u32 %s839_s15, 4  ;;  %s841_s25 = smov 8   ;;  %s575_s16 = int_to_ptr.vmem [resolvable:$true] %s574_s16 }
 0x19e   : > { %710 = dma.vmem_to_hbm [thread:$0]  (%p713_p13), %s575_s16, 256, %s577_s14, [#allocation5], %s840_s17, %s840_s17, %s841_s25  }
 0x19f   : > { %816 = dma.done.wait (%p713_p13), [#allocation5], 256  }
 0x1a0   : > { %818 = vsyncadd (%p713_p13), [#allocation5], 4294967040 }
 0x1a1 PF: > { %s16_s22 = sadd.s32 1, %s837_s22   ;;  %s1092_s18 = smov %s825_s19 }
 0x1a2   : > { %p13_p0 = scmp.ge.s32.totalorder %s16_s22, 4   ;;  %s1093_s19 = smov %s908_s27 }
 0x1a3   : > { %s1094_s20 = smov %s833_s21  ;;  %s1095_s21 = smov %s1097_s24 }
 0x1a4   :  { %15 = sbr.rel (!%p13_p0) target bundleno = 3 (0x3), region = 113 }
 0x1a9   :  { %593 = vsyncpa [#allocation5], 1 }
 0x1aa   :  { %595 = vsyncpa [#allocation5 + $0x1], 1 }

</bundles_post_ra>
